<compile_context>
chip_gen: v7x
topology: tpu7x:2x2x1
jax: 0.10.0
libtpu: 0.0.40
codegen_flags: <defaults>
</compile_context>

<pallas_src>
import functools

import jax
import jax.numpy as jnp
from jax.experimental import pallas as pl
from jax.experimental.pallas import tpu as pltpu

BN_EPS = 1e-5
LRELU_SLOPE = 0.2


# ----------------------------------------------------------------------------
# Pallas kernel: whole MLP in one shot (5 MXU matmuls + fused BN/LReLU + VPU
# final projection).
# ----------------------------------------------------------------------------
def _disc_kernel(x_ref, w0_ref, wslab_ref, vec_ref, score_ref, h_ref, *, dim):
    def bn_lrelu(y, layer):
        # Fused BN (training mode, batch stats) + LeakyReLU(0.2).
        g = vec_ref[layer:layer + 1, :dim]          # (1, dim) gamma
        be = vec_ref[5 + layer:6 + layer, :dim]     # (1, dim) beta
        mean = jnp.mean(y, axis=0, keepdims=True)
        diff = y - mean
        var = jnp.mean(diff * diff, axis=0, keepdims=True)
        scale = g * jax.lax.rsqrt(var + BN_EPS)     # rsqrt -> EUP slot
        shift = be - mean * scale
        y = y * scale + shift
        return jnp.where(y > 0, y, LRELU_SLOPE * y)

    # Layer 0: (B, latent_z) @ (latent_z, dim)   [pre-BN bias dropped: cancels]
    h = jnp.dot(x_ref[...].astype(jnp.bfloat16), w0_ref[...],
                preferred_element_type=jnp.float32)
    h = bn_lrelu(h, 0)

    # Layers 1..3 (rest of `base`): (B, dim) @ (dim, dim) from the weight slab.
    for i in (1, 2, 3):
        w = wslab_ref[(i - 1) * dim:i * dim, :]
        y = jnp.dot(h.astype(jnp.bfloat16), w, preferred_element_type=jnp.float32)
        h = bn_lrelu(y, i)
    h_ref[...] = h                                   # base(x)

    # d_final block 0: SNLinear(dim, dim) + BN + LReLU  (layer index 4)
    w4 = wslab_ref[3 * dim:4 * dim, :]
    y = jnp.dot(h.astype(jnp.bfloat16), w4, preferred_element_type=jnp.float32)
    d = bn_lrelu(y, 4)

    # Final SNLinear(dim, 1): VPU multiply + lane reduction (avoid N=1 MXU op),
    # written lane-dense into a (B, 128)-wide padded output.
    w5_row = vec_ref[10:11, :dim]                    # (1, dim)
    b5_row = vec_ref[11:12, :]                       # (1, VW), every lane = b5
    score = jnp.sum(d * w5_row, axis=1, keepdims=True)   # (B, 1)
    score_ref[...] = score + b5_row                  # broadcast -> (B, VW)


def discriminator_single_latent(x, packed_params):
    """x: (B, latent_z) f32. packed_params = (w0, wslab, vec)."""
    w0, wslab, vec = packed_params
    B = x.shape[0]
    latent_z = w0.shape[0]
    dim = w0.shape[1]
    VW = vec.shape[1]

    vmem = pl.BlockSpec(memory_space=pltpu.MemorySpace.VMEM)
    kernel = functools.partial(_disc_kernel, dim=dim)

    flops = 2 * B * dim * (latent_z + 4 * dim) + 2 * B * dim
    bytes_accessed = (x.size * 4 + w0.size * 2 + wslab.size * 2 + vec.size * 4
                      + B * VW * 4 + B * dim * 4)

    score_pad, h = pl.pallas_call(
        kernel,
        out_shape=(
            jax.ShapeDtypeStruct((B, VW), jnp.float32),   # lane-dense padded score
            jax.ShapeDtypeStruct((B, dim), jnp.float32),  # base(x)
        ),
        in_specs=[vmem, vmem, vmem, vmem],
        out_specs=(vmem, vmem),
        cost_estimate=pl.CostEstimate(
            flops=int(flops),
            transcendentals=5 * dim,          # rsqrt per feature per BN layer
            bytes_accessed=int(bytes_accessed)),
    )(x, w0, wslab, vec)

    return score_pad[:, :1], h


# ----------------------------------------------------------------------------
# Parameter setup (plain-JAX glue): deterministic init + spectral norm.
# ----------------------------------------------------------------------------
def _spectral_normalize(w, key, num_itrs=1, eps=1e-12):
    # w: (out_features, in_features), torch.nn.Linear layout.
    u = jax.random.normal(key, (w.shape[0],), dtype=jnp.float32)
    u = u / (jnp.linalg.norm(u) + eps)
    v = None
    for _ in range(num_itrs):
        v = w.T @ u
        v = v / (jnp.linalg.norm(v) + eps)
        u = w @ v
        u = u / (jnp.linalg.norm(u) + eps)
    sigma = u @ (w @ v)
    return w / sigma


def init_params(key, latent_z, dim):
    """Torch-layout weights (out,in), biases, BN affine params."""
    layer_dims = [(latent_z, dim)] + [(dim, dim)] * 4 + [(dim, 1)]
    Ws, Bs = [], []
    for fan_in, fan_out in layer_dims:
        key, kw, kb, ku = jax.random.split(key, 4)
        w = jax.random.normal(kw, (fan_out, fan_in), dtype=jnp.float32) * 0.05
        w = _spectral_normalize(w, ku, num_itrs=1, eps=1e-12)
        b = jax.random.normal(kb, (fan_out,), dtype=jnp.float32) * 0.01
        Ws.append(w)
        Bs.append(b)
    gammas = [jnp.ones((dim,), jnp.float32) for _ in range(5)]
    betas = [jnp.zeros((dim,), jnp.float32) for _ in range(5)]
    return Ws, Bs, gammas, betas


def pack_params(Ws, Bs, gammas, betas, dim):
    """Pack into the 3 kernel operands. Pre-BN biases (Bs[0..4]) are dropped
    on purpose: a bias added before BatchNorm is exactly cancelled by the mean
    subtraction."""
    w0 = jnp.asarray(Ws[0].T, dtype=jnp.bfloat16)                      # (latent_z, dim)
    wslab = jnp.concatenate([W.T for W in Ws[1:5]], axis=0)            # (4*dim, dim)
    wslab = wslab.astype(jnp.bfloat16)

    VW = max(dim, 128)

    def pad_row(v):
        row = jnp.zeros((1, VW), jnp.float32)
        return row.at[0, :v.shape[0]].set(v.astype(jnp.float32))

    rows = [pad_row(g) for g in gammas]            # rows 0..4  : gammas
    rows += [pad_row(b) for b in betas]            # rows 5..9  : betas
    rows.append(pad_row(Ws[5][0]))                 # row 10     : w5 as a row
    rows.append(jnp.full((1, VW), Bs[5][0], jnp.float32))  # row 11: b5 broadcast
    vec = jnp.concatenate(rows, axis=0)            # (12, VW) f32
    return w0, wslab, vec


# ----------------------------------------------------------------------------
# Pure-JAX reference (keeps the module's pre-BN biases; uses the same bf16
# matmul operand policy with f32 accumulation for a tight comparison).
# ----------------------------------------------------------------------------
def _reference(x, Ws, Bs, gammas, betas):
    def block(h, W, b, g, be):
        y = jnp.dot(h.astype(jnp.bfloat16), W.T.astype(jnp.bfloat16),
                    preferred_element_type=jnp.float32) + b
        mean = jnp.mean(y, axis=0, keepdims=True)
        var = jnp.mean((y - mean) ** 2, axis=0, keepdims=True)
        y = g * ((y - mean) / jnp.sqrt(var + BN_EPS)) + be
        return jnp.where(y > 0, y, LRELU_SLOPE * y)

    h = x
    for i in range(4):
        h = block(h, Ws[i], Bs[i], gammas[i], betas[i])
    d = block(h, Ws[4], Bs[4], gammas[4], betas[4])
    score = d @ Ws[5].T + Bs[5]                    # final layer in f32 (as kernel)
    return score, h


if __name__ == "__main__":
    # Small shapes consistent with the module: nfilterD=4 -> dim=64,
    # latent_z_size=32, batch=8.
    B, LATENT_Z, NFILTER_D = 8, 32, 4
    DIM = NFILTER_D * 16

    key = jax.random.PRNGKey(0)
    key, kx, kp = jax.random.split(key, 3)
    x = jax.random.normal(kx, (B, LATENT_Z), dtype=jnp.float32)

    Ws, Bs, gammas, betas = init_params(kp, LATENT_Z, DIM)
    packed = pack_params(Ws, Bs, gammas, betas, DIM)

    score, h = discriminator_single_latent(x, packed)
    jax.block_until_ready((score, h))
    assert score.shape == (B, 1) and h.shape == (B, DIM)

    ref_score, ref_h = _reference(x, Ws, Bs, gammas, betas)
    assert jnp.allclose(h, ref_h, atol=2e-3, rtol=2e-3)
    assert jnp.allclose(score, ref_score, atol=2e-3, rtol=2e-3)

    print("KERNEL_OK")
</pallas_src>

<mosaic_0001>
module attributes {stable_mosaic.version = 11 : i64} {
  func.func @_disc_kernel(%arg0: memref<8x32xf32, #tpu.memory_space<vmem>>, %arg1: memref<32x64xbf16, #tpu.memory_space<vmem>>, %arg2: memref<256x64xbf16, #tpu.memory_space<vmem>>, %arg3: memref<12x128xf32, #tpu.memory_space<vmem>>, %arg4: memref<8x128xf32, #tpu.memory_space<vmem>>, %arg5: memref<8x64xf32, #tpu.memory_space<vmem>>) attributes {dimension_semantics = [], scalar_prefetch = 0 : i64, scratch_operands = 0 : i64, tpu.core_type = #tpu.core_type<tc>} {
    %c0 = arith.constant 0 : index
    %c0_0 = arith.constant 0 : index
    %0 = vector.load %arg0[%c0, %c0_0] : memref<8x32xf32, #tpu.memory_space<vmem>>, vector<8x32xf32>
    %1 = arith.truncf %0 : vector<8x32xf32> to vector<8x32xbf16>
    %c0_1 = arith.constant 0 : index
    %c0_2 = arith.constant 0 : index
    %2 = vector.load %arg1[%c0_1, %c0_2] : memref<32x64xbf16, #tpu.memory_space<vmem>>, vector<32x64xbf16>
    %cst = arith.constant dense<0.000000e+00> : vector<8x64xf32>
    %3 = tpu.matmul %1, %2, %cst {dimension_numbers = #tpu.dot_dimension_numbers<[1], [0], [0], [1], [0, 0, 1, 1], [], []>} : vector<8x32xbf16>, vector<32x64xbf16>, vector<8x64xf32> -> vector<8x64xf32>
    %c0_3 = arith.constant 0 : index
    %c0_4 = arith.constant 0 : index
    %4 = vector.load %arg3[%c0_3, %c0_4] : memref<12x128xf32, #tpu.memory_space<vmem>>, vector<1x64xf32>
    %c5 = arith.constant 5 : index
    %c0_5 = arith.constant 0 : index
    %5 = vector.load %arg3[%c5, %c0_5] : memref<12x128xf32, #tpu.memory_space<vmem>>, vector<1x64xf32>
    %cst_6 = arith.constant dense<0.000000e+00> : vector<64xf32>
    %6 = vector.multi_reduction <add>, %3, %cst_6 [0] : vector<8x64xf32> to vector<64xf32>
    %7 = vector.shape_cast %6 : vector<64xf32> to vector<1x64xf32>
    %cst_7 = arith.constant 8.000000e+00 : f32
    %8 = vector.broadcast %cst_7 : f32 to vector<1x64xf32>
    %9 = arith.divf %7, %8 : vector<1x64xf32>
    %10 = vector.broadcast %9 : vector<1x64xf32> to vector<8x64xf32>
    %11 = arith.subf %3, %10 : vector<8x64xf32>
    %12 = arith.mulf %11, %11 : vector<8x64xf32>
    %cst_8 = arith.constant dense<0.000000e+00> : vector<64xf32>
    %13 = vector.multi_reduction <add>, %12, %cst_8 [0] : vector<8x64xf32> to vector<64xf32>
    %14 = vector.shape_cast %13 : vector<64xf32> to vector<1x64xf32>
    %cst_9 = arith.constant 8.000000e+00 : f32
    %15 = vector.broadcast %cst_9 : f32 to vector<1x64xf32>
    %16 = arith.divf %14, %15 : vector<1x64xf32>
    %cst_10 = arith.constant 9.99999974E-6 : f32
    %17 = vector.broadcast %cst_10 : f32 to vector<1x64xf32>
    %18 = arith.addf %16, %17 : vector<1x64xf32>
    %19 = math.rsqrt %18 : vector<1x64xf32>
    %20 = arith.mulf %4, %19 : vector<1x64xf32>
    %21 = arith.mulf %9, %20 : vector<1x64xf32>
    %22 = arith.subf %5, %21 : vector<1x64xf32>
    %23 = vector.broadcast %20 : vector<1x64xf32> to vector<8x64xf32>
    %24 = arith.mulf %3, %23 : vector<8x64xf32>
    %25 = vector.broadcast %22 : vector<1x64xf32> to vector<8x64xf32>
    %26 = arith.addf %24, %25 : vector<8x64xf32>
    %cst_11 = arith.constant 0.000000e+00 : f32
    %27 = vector.broadcast %cst_11 : f32 to vector<8x64xf32>
    %28 = arith.cmpf ogt, %26, %27 : vector<8x64xf32>
    %cst_12 = arith.constant 2.000000e-01 : f32
    %29 = vector.broadcast %cst_12 : f32 to vector<8x64xf32>
    %30 = arith.mulf %29, %26 : vector<8x64xf32>
    %31 = arith.select %28, %26, %30 : vector<8x64xi1>, vector<8x64xf32>
    %c0_13 = arith.constant 0 : index
    %c0_14 = arith.constant 0 : index
    %32 = vector.load %arg2[%c0_13, %c0_14] : memref<256x64xbf16, #tpu.memory_space<vmem>>, vector<64x64xbf16>
    %33 = arith.truncf %31 : vector<8x64xf32> to vector<8x64xbf16>
    %cst_15 = arith.constant dense<0.000000e+00> : vector<8x64xf32>
    %34 = tpu.matmul %33, %32, %cst_15 {dimension_numbers = #tpu.dot_dimension_numbers<[1], [0], [0], [1], [0, 0, 1, 1], [], []>} : vector<8x64xbf16>, vector<64x64xbf16>, vector<8x64xf32> -> vector<8x64xf32>
    %c1 = arith.constant 1 : index
    %c0_16 = arith.constant 0 : index
    %35 = vector.load %arg3[%c1, %c0_16] : memref<12x128xf32, #tpu.memory_space<vmem>>, vector<1x64xf32>
    %c6 = arith.constant 6 : index
    %c0_17 = arith.constant 0 : index
    %36 = vector.load %arg3[%c6, %c0_17] : memref<12x128xf32, #tpu.memory_space<vmem>>, vector<1x64xf32>
    %cst_18 = arith.constant dense<0.000000e+00> : vector<64xf32>
    %37 = vector.multi_reduction <add>, %34, %cst_18 [0] : vector<8x64xf32> to vector<64xf32>
    %38 = vector.shape_cast %37 : vector<64xf32> to vector<1x64xf32>
    %cst_19 = arith.constant 8.000000e+00 : f32
    %39 = vector.broadcast %cst_19 : f32 to vector<1x64xf32>
    %40 = arith.divf %38, %39 : vector<1x64xf32>
    %41 = vector.broadcast %40 : vector<1x64xf32> to vector<8x64xf32>
    %42 = arith.subf %34, %41 : vector<8x64xf32>
    %43 = arith.mulf %42, %42 : vector<8x64xf32>
    %cst_20 = arith.constant dense<0.000000e+00> : vector<64xf32>
    %44 = vector.multi_reduction <add>, %43, %cst_20 [0] : vector<8x64xf32> to vector<64xf32>
    %45 = vector.shape_cast %44 : vector<64xf32> to vector<1x64xf32>
    %cst_21 = arith.constant 8.000000e+00 : f32
    %46 = vector.broadcast %cst_21 : f32 to vector<1x64xf32>
    %47 = arith.divf %45, %46 : vector<1x64xf32>
    %cst_22 = arith.constant 9.99999974E-6 : f32
    %48 = vector.broadcast %cst_22 : f32 to vector<1x64xf32>
    %49 = arith.addf %47, %48 : vector<1x64xf32>
    %50 = math.rsqrt %49 : vector<1x64xf32>
    %51 = arith.mulf %35, %50 : vector<1x64xf32>
    %52 = arith.mulf %40, %51 : vector<1x64xf32>
    %53 = arith.subf %36, %52 : vector<1x64xf32>
    %54 = vector.broadcast %51 : vector<1x64xf32> to vector<8x64xf32>
    %55 = arith.mulf %34, %54 : vector<8x64xf32>
    %56 = vector.broadcast %53 : vector<1x64xf32> to vector<8x64xf32>
    %57 = arith.addf %55, %56 : vector<8x64xf32>
    %cst_23 = arith.constant 0.000000e+00 : f32
    %58 = vector.broadcast %cst_23 : f32 to vector<8x64xf32>
    %59 = arith.cmpf ogt, %57, %58 : vector<8x64xf32>
    %cst_24 = arith.constant 2.000000e-01 : f32
    %60 = vector.broadcast %cst_24 : f32 to vector<8x64xf32>
    %61 = arith.mulf %60, %57 : vector<8x64xf32>
    %62 = arith.select %59, %57, %61 : vector<8x64xi1>, vector<8x64xf32>
    %c64 = arith.constant 64 : index
    %c0_25 = arith.constant 0 : index
    %63 = vector.load %arg2[%c64, %c0_25] : memref<256x64xbf16, #tpu.memory_space<vmem>>, vector<64x64xbf16>
    %64 = arith.truncf %62 : vector<8x64xf32> to vector<8x64xbf16>
    %cst_26 = arith.constant dense<0.000000e+00> : vector<8x64xf32>
    %65 = tpu.matmul %64, %63, %cst_26 {dimension_numbers = #tpu.dot_dimension_numbers<[1], [0], [0], [1], [0, 0, 1, 1], [], []>} : vector<8x64xbf16>, vector<64x64xbf16>, vector<8x64xf32> -> vector<8x64xf32>
    %c2 = arith.constant 2 : index
    %c0_27 = arith.constant 0 : index
    %66 = vector.load %arg3[%c2, %c0_27] : memref<12x128xf32, #tpu.memory_space<vmem>>, vector<1x64xf32>
    %c7 = arith.constant 7 : index
    %c0_28 = arith.constant 0 : index
    %67 = vector.load %arg3[%c7, %c0_28] : memref<12x128xf32, #tpu.memory_space<vmem>>, vector<1x64xf32>
    %cst_29 = arith.constant dense<0.000000e+00> : vector<64xf32>
    %68 = vector.multi_reduction <add>, %65, %cst_29 [0] : vector<8x64xf32> to vector<64xf32>
    %69 = vector.shape_cast %68 : vector<64xf32> to vector<1x64xf32>
    %cst_30 = arith.constant 8.000000e+00 : f32
    %70 = vector.broadcast %cst_30 : f32 to vector<1x64xf32>
    %71 = arith.divf %69, %70 : vector<1x64xf32>
    %72 = vector.broadcast %71 : vector<1x64xf32> to vector<8x64xf32>
    %73 = arith.subf %65, %72 : vector<8x64xf32>
    %74 = arith.mulf %73, %73 : vector<8x64xf32>
    %cst_31 = arith.constant dense<0.000000e+00> : vector<64xf32>
    %75 = vector.multi_reduction <add>, %74, %cst_31 [0] : vector<8x64xf32> to vector<64xf32>
    %76 = vector.shape_cast %75 : vector<64xf32> to vector<1x64xf32>
    %cst_32 = arith.constant 8.000000e+00 : f32
    %77 = vector.broadcast %cst_32 : f32 to vector<1x64xf32>
    %78 = arith.divf %76, %77 : vector<1x64xf32>
    %cst_33 = arith.constant 9.99999974E-6 : f32
    %79 = vector.broadcast %cst_33 : f32 to vector<1x64xf32>
    %80 = arith.addf %78, %79 : vector<1x64xf32>
    %81 = math.rsqrt %80 : vector<1x64xf32>
    %82 = arith.mulf %66, %81 : vector<1x64xf32>
    %83 = arith.mulf %71, %82 : vector<1x64xf32>
    %84 = arith.subf %67, %83 : vector<1x64xf32>
    %85 = vector.broadcast %82 : vector<1x64xf32> to vector<8x64xf32>
    %86 = arith.mulf %65, %85 : vector<8x64xf32>
    %87 = vector.broadcast %84 : vector<1x64xf32> to vector<8x64xf32>
    %88 = arith.addf %86, %87 : vector<8x64xf32>
    %cst_34 = arith.constant 0.000000e+00 : f32
    %89 = vector.broadcast %cst_34 : f32 to vector<8x64xf32>
    %90 = arith.cmpf ogt, %88, %89 : vector<8x64xf32>
    %cst_35 = arith.constant 2.000000e-01 : f32
    %91 = vector.broadcast %cst_35 : f32 to vector<8x64xf32>
    %92 = arith.mulf %91, %88 : vector<8x64xf32>
    %93 = arith.select %90, %88, %92 : vector<8x64xi1>, vector<8x64xf32>
    %c128 = arith.constant 128 : index
    %c0_36 = arith.constant 0 : index
    %94 = vector.load %arg2[%c128, %c0_36] : memref<256x64xbf16, #tpu.memory_space<vmem>>, vector<64x64xbf16>
    %95 = arith.truncf %93 : vector<8x64xf32> to vector<8x64xbf16>
    %cst_37 = arith.constant dense<0.000000e+00> : vector<8x64xf32>
    %96 = tpu.matmul %95, %94, %cst_37 {dimension_numbers = #tpu.dot_dimension_numbers<[1], [0], [0], [1], [0, 0, 1, 1], [], []>} : vector<8x64xbf16>, vector<64x64xbf16>, vector<8x64xf32> -> vector<8x64xf32>
    %c3 = arith.constant 3 : index
    %c0_38 = arith.constant 0 : index
    %97 = vector.load %arg3[%c3, %c0_38] : memref<12x128xf32, #tpu.memory_space<vmem>>, vector<1x64xf32>
    %c8 = arith.constant 8 : index
    %c0_39 = arith.constant 0 : index
    %98 = vector.load %arg3[%c8, %c0_39] : memref<12x128xf32, #tpu.memory_space<vmem>>, vector<1x64xf32>
    %cst_40 = arith.constant dense<0.000000e+00> : vector<64xf32>
    %99 = vector.multi_reduction <add>, %96, %cst_40 [0] : vector<8x64xf32> to vector<64xf32>
    %100 = vector.shape_cast %99 : vector<64xf32> to vector<1x64xf32>
    %cst_41 = arith.constant 8.000000e+00 : f32
    %101 = vector.broadcast %cst_41 : f32 to vector<1x64xf32>
    %102 = arith.divf %100, %101 : vector<1x64xf32>
    %103 = vector.broadcast %102 : vector<1x64xf32> to vector<8x64xf32>
    %104 = arith.subf %96, %103 : vector<8x64xf32>
    %105 = arith.mulf %104, %104 : vector<8x64xf32>
    %cst_42 = arith.constant dense<0.000000e+00> : vector<64xf32>
    %106 = vector.multi_reduction <add>, %105, %cst_42 [0] : vector<8x64xf32> to vector<64xf32>
    %107 = vector.shape_cast %106 : vector<64xf32> to vector<1x64xf32>
    %cst_43 = arith.constant 8.000000e+00 : f32
    %108 = vector.broadcast %cst_43 : f32 to vector<1x64xf32>
    %109 = arith.divf %107, %108 : vector<1x64xf32>
    %cst_44 = arith.constant 9.99999974E-6 : f32
    %110 = vector.broadcast %cst_44 : f32 to vector<1x64xf32>
    %111 = arith.addf %109, %110 : vector<1x64xf32>
    %112 = math.rsqrt %111 : vector<1x64xf32>
    %113 = arith.mulf %97, %112 : vector<1x64xf32>
    %114 = arith.mulf %102, %113 : vector<1x64xf32>
    %115 = arith.subf %98, %114 : vector<1x64xf32>
    %116 = vector.broadcast %113 : vector<1x64xf32> to vector<8x64xf32>
    %117 = arith.mulf %96, %116 : vector<8x64xf32>
    %118 = vector.broadcast %115 : vector<1x64xf32> to vector<8x64xf32>
    %119 = arith.addf %117, %118 : vector<8x64xf32>
    %cst_45 = arith.constant 0.000000e+00 : f32
    %120 = vector.broadcast %cst_45 : f32 to vector<8x64xf32>
    %121 = arith.cmpf ogt, %119, %120 : vector<8x64xf32>
    %cst_46 = arith.constant 2.000000e-01 : f32
    %122 = vector.broadcast %cst_46 : f32 to vector<8x64xf32>
    %123 = arith.mulf %122, %119 : vector<8x64xf32>
    %124 = arith.select %121, %119, %123 : vector<8x64xi1>, vector<8x64xf32>
    %c0_47 = arith.constant 0 : index
    %c0_48 = arith.constant 0 : index
    %125 = vector.load %arg5[%c0_47, %c0_48] : memref<8x64xf32, #tpu.memory_space<vmem>>, vector<8x64xf32>
    tpu.vector_store %arg5[%c0_47, %c0_48], %124 {strides = array<i32>} : memref<8x64xf32, #tpu.memory_space<vmem>>, vector<8x64xf32>,
    %c192 = arith.constant 192 : index
    %c0_49 = arith.constant 0 : index
    %126 = vector.load %arg2[%c192, %c0_49] : memref<256x64xbf16, #tpu.memory_space<vmem>>, vector<64x64xbf16>
    %127 = arith.truncf %124 : vector<8x64xf32> to vector<8x64xbf16>
    %cst_50 = arith.constant dense<0.000000e+00> : vector<8x64xf32>
    %128 = tpu.matmul %127, %126, %cst_50 {dimension_numbers = #tpu.dot_dimension_numbers<[1], [0], [0], [1], [0, 0, 1, 1], [], []>} : vector<8x64xbf16>, vector<64x64xbf16>, vector<8x64xf32> -> vector<8x64xf32>
    %c4 = arith.constant 4 : index
    %c0_51 = arith.constant 0 : index
    %129 = vector.load %arg3[%c4, %c0_51] : memref<12x128xf32, #tpu.memory_space<vmem>>, vector<1x64xf32>
    %c9 = arith.constant 9 : index
    %c0_52 = arith.constant 0 : index
    %130 = vector.load %arg3[%c9, %c0_52] : memref<12x128xf32, #tpu.memory_space<vmem>>, vector<1x64xf32>
    %cst_53 = arith.constant dense<0.000000e+00> : vector<64xf32>
    %131 = vector.multi_reduction <add>, %128, %cst_53 [0] : vector<8x64xf32> to vector<64xf32>
    %132 = vector.shape_cast %131 : vector<64xf32> to vector<1x64xf32>
    %cst_54 = arith.constant 8.000000e+00 : f32
    %133 = vector.broadcast %cst_54 : f32 to vector<1x64xf32>
    %134 = arith.divf %132, %133 : vector<1x64xf32>
    %135 = vector.broadcast %134 : vector<1x64xf32> to vector<8x64xf32>
    %136 = arith.subf %128, %135 : vector<8x64xf32>
    %137 = arith.mulf %136, %136 : vector<8x64xf32>
    %cst_55 = arith.constant dense<0.000000e+00> : vector<64xf32>
    %138 = vector.multi_reduction <add>, %137, %cst_55 [0] : vector<8x64xf32> to vector<64xf32>
    %139 = vector.shape_cast %138 : vector<64xf32> to vector<1x64xf32>
    %cst_56 = arith.constant 8.000000e+00 : f32
    %140 = vector.broadcast %cst_56 : f32 to vector<1x64xf32>
    %141 = arith.divf %139, %140 : vector<1x64xf32>
    %cst_57 = arith.constant 9.99999974E-6 : f32
    %142 = vector.broadcast %cst_57 : f32 to vector<1x64xf32>
    %143 = arith.addf %141, %142 : vector<1x64xf32>
    %144 = math.rsqrt %143 : vector<1x64xf32>
    %145 = arith.mulf %129, %144 : vector<1x64xf32>
    %146 = arith.mulf %134, %145 : vector<1x64xf32>
    %147 = arith.subf %130, %146 : vector<1x64xf32>
    %148 = vector.broadcast %145 : vector<1x64xf32> to vector<8x64xf32>
    %149 = arith.mulf %128, %148 : vector<8x64xf32>
    %150 = vector.broadcast %147 : vector<1x64xf32> to vector<8x64xf32>
    %151 = arith.addf %149, %150 : vector<8x64xf32>
    %cst_58 = arith.constant 0.000000e+00 : f32
    %152 = vector.broadcast %cst_58 : f32 to vector<8x64xf32>
    %153 = arith.cmpf ogt, %151, %152 : vector<8x64xf32>
    %cst_59 = arith.constant 2.000000e-01 : f32
    %154 = vector.broadcast %cst_59 : f32 to vector<8x64xf32>
    %155 = arith.mulf %154, %151 : vector<8x64xf32>
    %156 = arith.select %153, %151, %155 : vector<8x64xi1>, vector<8x64xf32>
    %c10 = arith.constant 10 : index
    %c0_60 = arith.constant 0 : index
    %157 = vector.load %arg3[%c10, %c0_60] : memref<12x128xf32, #tpu.memory_space<vmem>>, vector<1x64xf32>
    %c11 = arith.constant 11 : index
    %c0_61 = arith.constant 0 : index
    %158 = vector.load %arg3[%c11, %c0_61] : memref<12x128xf32, #tpu.memory_space<vmem>>, vector<1x128xf32>
    %159 = vector.broadcast %157 : vector<1x64xf32> to vector<8x64xf32>
    %160 = arith.mulf %156, %159 : vector<8x64xf32>
    %cst_62 = arith.constant dense<0.000000e+00> : vector<8xf32>
    %161 = vector.multi_reduction <add>, %160, %cst_62 [1] : vector<8x64xf32> to vector<8xf32>
    %162 = vector.shape_cast %161 : vector<8xf32> to vector<8x1xf32>
    %163 = vector.broadcast %162 : vector<8x1xf32> to vector<8x128xf32>
    %164 = vector.broadcast %158 : vector<1x128xf32> to vector<8x128xf32>
    %165 = arith.addf %163, %164 : vector<8x128xf32>
    %c0_63 = arith.constant 0 : index
    %c0_64 = arith.constant 0 : index
    %166 = vector.load %arg4[%c0_63, %c0_64] : memref<8x128xf32, #tpu.memory_space<vmem>>, vector<8x128xf32>
    tpu.vector_store %arg4[%c0_63, %c0_64], %165 {strides = array<i32>} : memref<8x128xf32, #tpu.memory_space<vmem>>, vector<8x128xf32>,
    return
  }
}

</mosaic_0001>

<bundles_post_ra>
// kernel: tpu_custom_call.1
= control target key start
LH: loop header
LB: loop body
LE: loop exit
PB: predicated region body
PF: predicated region fallthrough
CT: control target
= control target key end

     0   :  { %11 = vsyncpa [#allocation3], 0  ;;  %v809_v1 = vmov 0.0   ;;  %vm810_vm0 = vmmov 0   ;;  %vm40_vm1 = vcmask 261120   ;;  %s1016_s0 = inlined_call_operand.vmem [shape: f32[8,32], index: 0, kind: input, shape index: {}]   ;;  %s1017_s1 = inlined_call_operand.vmem [shape: bf16[32,64], index: 1, kind: input, shape index: {}]   ;;  %s1018_s2 = inlined_call_operand.vmem [shape: bf16[256,64], index: 2, kind: input, shape index: {}]   ;;  %s1019_s3 = inlined_call_operand.vmem [shape: f32[12,128], index: 3, kind: input, shape index: {}]   ;;  %s1020_s4 = inlined_call_operand.hbm [shape: f32[8,128], index: 4, kind: output, shape index: {0}]   ;;  %s1021_s5 = inlined_call_operand.hbm [shape: f32[8,64], index: 5, kind: output, shape index: {1}]  }
   0x1   :  { %v733_v0 = vld [vmem:[%s1017_s1] sm:$0xff]   ;;  %673 = vmatprep.subr.bf16.mxu0 %v809_v1  ;;  %v734_v2 = vld [vmem:[%s1017_s1 + $0x8] sm:$0xff]   ;;  %681 = vmatprep.subr.bf16.mxu1 %v809_v1 }
   0x2   :  { %674 = vmatpush3.bf16.msra.mxu0 %v733_v0  ;;  %677 = vmatprep.mubr.msk.bf16.mxu0 %vm810_vm0, %v809_v1  ;;  %v22_v3 = vld [vmem:[%s1016_s0] sm:$0xff] }
   0x3   :  { %675 = vmatprep.subr.bf16.mxu0 %v809_v1  ;;  %689 = vmatprep.mubr.msk.bf16.mxu1 %vm810_vm0, %v809_v1  ;;  %v23_v4 = vpack.c.bf16 %v22_v3, %v22_v3 }
   0x6   :  { %676 = vmatpush3.bf16.msra.mxu0 %v734_v2 }
   0x7   :  { %693 = vmatprep.subr.bf16.mxu0 %v809_v1 }
   0x9   :  { %678 = vmatmul.mubr.msk.bf16.vlgmr.msra.gmra.mrb[0].mxu0 %vm40_vm1, %v23_v4 }
   0xa   :  { %701 = vmatprep.mubr.msk.bf16.mxu0 %vm810_vm0, %v809_v1 }
   0xb   :  { %12 = vsyncpa [#allocation5], 0  ;;  %v735_v5 = vld [vmem:[%s1018_s2] sm:$0xff]   ;;  %v736_v6 = vld [vmem:[%s1018_s2 + $0x8] sm:$0xff]   ;;  %vm86_vm2 = vcmask 523264   ;;  %v111_v32 = vlaneseq  ;;  %s811_s23 = smov [#allocation4]  }
   0xc   :  { %682 = vmatpush3.bf16.msra.mxu1 %v735_v5  ;;  %v737_v7 = vld [vmem:[%s1018_s2 + $0x10] sm:$0xff]   ;;  %v738_v8 = vld [vmem:[%s1018_s2 + $0x18] sm:$0xff]   ;;  %v84_v34 = vld [vmem:[%s1019_s3] sm:$0x1]  ;;  %s613_s1 = sshll.u32 %s811_s23, 4  ;;  %s614_s1 = int_to_ptr.vmem [resolvable:$true] %s613_s1 }
   0xd   :  { %683 = vmatprep.subr.bf16.mxu1 %v809_v1  ;;  %v112_v33 = vshrl.u32 %v111_v32, 7  ;;  %v85_v38 = vld [vmem:[%s1019_s3 + $0x5] sm:$0x1]  ;;  %v740_v49 = vld [vmem:[%s1018_s2 + $0x28] sm:$0xff]   ;;  %v741_v50 = vld [vmem:[%s1018_s2 + $0x30] sm:$0xff]   ;;  %s761_s24 = scalar_lea.vmem %s614_s1, 128  ;;  %p766_p1 = scmp.lt.s32.totalorder %s614_s1, %s614_s1 }
   0xe   :  { %v739_v48 = vld [vmem:[%s1018_s2 + $0x20] sm:$0xff]   ;;  %v742_v51 = vld [vmem:[%s1018_s2 + $0x38] sm:$0xff]   ;;  %p762_p0 = scmp.ne.s32.totalorder %s614_s1, %s761_s24  ;;  %p767_p2 = scmp.lt.s32.totalorder %s761_s24, %s761_s24 }
   0xf   :  { %v883_v35 = vsub.s32 0, %v112_v33  ;;  %694 = vmatpush3.bf16.msra.mxu0 %v739_v48 }
  0x10   :  { %684 = vmatpush3.bf16.msra.mxu1 %v736_v6  ;;  %695 = vmatprep.subr.bf16.mxu0 %v809_v1  ;;  %p768_p3 = por %p767_p2, %p766_p1 }
  0x11   :  { %685 = vmatprep.subr.bf16.mxu1 %v809_v1 }
  0x12   :  { %p769_p4 = pnand %p768_p3, %p762_p0 }
  0x13   :  { %696 = vmatpush3.bf16.msra.mxu0 %v740_v49 }
  0x14   :  { %686 = vmatpush3.bf16.msra.mxu1 %v737_v7  ;;  %697 = vmatprep.subr.bf16.mxu0 %v809_v1 }
  0x15   :  { %687 = vmatprep.subr.bf16.mxu1 %v809_v1 }
  0x17   :  { %698 = vmatpush3.bf16.msra.mxu0 %v741_v50 }
  0x18   :  { %688 = vmatpush3.bf16.msra.mxu1 %v738_v8  ;;  %699 = vmatprep.subr.bf16.mxu0 %v809_v1 }
  0x19   :  { %705 = vmatprep.subr.bf16.mxu1 %v809_v1 }
  0x1b   :  { %700 = vmatpush3.bf16.msra.mxu0 %v742_v51 }
  0x1c   :  { %717 = vmatprep.subr.bf16.mxu0 %v809_v1 }
  0xdc   :  { %v78_v9 = vpop.f32.mrb[0].mxu0 }
  0xdd   :  { %v87_v10 = vsel %vm86_vm2, %v78_v9, 0.0  ;;  %v679_v11 = vpop.f32.mrb[1].mxu0 }
  0xde   :  { %v88_v12 = vrot.slane %v87_v10, 4  ;;  %v81_v13 = vpop.f32.mrb[2].mxu0 }
  0xdf   :  { %v680_v14 = vpop.f32.mrb[3].mxu0 }
  0xe0   :  { %v89_v15 = vadd.f32 %v88_v12, %v87_v10  ;;  %v200_v12 = vld [vmem:[%s1019_s3 + $0x1] sm:$0x1] }
  0xe2   :  { %v90_v16 = vrot.slane %v89_v15, 2 }
  0xe4   :  { %v91_v17 = vadd.f32 %v90_v16, %v89_v15  ;;  %v201_v15 = vld [vmem:[%s1019_s3 + $0x6] sm:$0x1] }
  0xe6   :  { %v92_v18 = vrot.slane %v91_v17, 1 }
  0xe8   :  { %v93_v19 = vadd.f32 %v92_v18, %v91_v17 }
  0xea   :  { %v95_v20 = vmul.f32 0.125, %v93_v19 }
  0xec   :  { %v96_v21 = vsub.f32 %v78_v9, %v95_v20 }
  0xee   :  { %v97_v22 = vmul.f32 %v96_v21, %v96_v21 }
  0xf0   :  { %v98_v23 = vsel %vm86_vm2, %v97_v22, 0.0 }
  0xf1   :  { %v99_v24 = vrot.slane %v98_v23, 4 }
  0xf3   :  { %v100_v25 = vadd.f32 %v99_v24, %v98_v23 }
  0xf5   :  { %v101_v26 = vrot.slane %v100_v25, 2 }
  0xf7   :  { %v102_v27 = vadd.f32 %v101_v26, %v100_v25  ;;  %v743_v25 = vld [vmem:[%s1018_s2 + $0x40] sm:$0xff]   ;;  %v744_v26 = vld [vmem:[%s1018_s2 + $0x48] sm:$0xff]  }
  0xf9   :  { %v103_v28 = vrot.slane %v102_v27, 1 }
  0xfb   :  { %v104_v29 = vadd.f32 %v103_v28, %v102_v27  ;;  %v745_v27 = vld [vmem:[%s1018_s2 + $0x50] sm:$0xff]   ;;  %v746_v28 = vld [vmem:[%s1018_s2 + $0x58] sm:$0xff]  }
  0xfd   :  { %v105_v30 = vmul.f32 0.125, %v104_v29 }
  0xff   :  { %v106_v31 = vadd.f32 1e-05, %v105_v30 }
 0x101   :  { %751 = vrsqrt.f32 %v106_v31 }
 0x10b   :  { %v752_v36 = vpop.eup %751 }
 0x10c   :  { %v108_v37 = vmul.f32 %v752_v36, %v84_v34 }
 0x10e   :  { %v109_v39 = vmul.f32 %v108_v37, %v95_v20  ;;  %v114_v40 = vrot.slane %v108_v37, %v883_v35 }
 0x110   :  { %v110_v41 = vsub.f32 %v85_v38, %v109_v39  ;;  %v115_v42 = vmul.f32 %v114_v40, %v78_v9 }
 0x112   :  { %v119_v43 = vrot.slane %v110_v41, %v883_v35 }
 0x114   :  { %v120_v44 = vadd.f32 %v119_v43, %v115_v42 }
 0x116   :  { %v122_v45 = vmul.f32 0.2, %v120_v44  ;;  %vm121_vm3 = vcmp.gt.f32.partialorder %v120_v44, 0.0 }
 0x118   :  { %v123_v46 = vsel %vm121_vm3, %v120_v44, %v122_v45 }
 0x119   :  { %v132_v47 = vpack.c.bf16 %v123_v46, %v123_v46 }
 0x11b   :  { %690 = vmatmul.mubr.msk.bf16.vlgmr.msra.gmra.mrb[0].mxu1 %vm86_vm2, %v132_v47 }
 0x11c   :  { %713 = vmatprep.mubr.msk.bf16.mxu1 %vm810_vm0, %v809_v1  ;;  %706 = vmatpush3.bf16.msra.mxu1 %v743_v25 }
 0x11d   :  { %707 = vmatprep.subr.bf16.mxu1 %v809_v1 }
 0x120   :  { %708 = vmatpush3.bf16.msra.mxu1 %v744_v26 }
 0x121   :  { %709 = vmatprep.subr.bf16.mxu1 %v809_v1 }
 0x124   :  { %710 = vmatpush3.bf16.msra.mxu1 %v745_v27 }
 0x125   :  { %711 = vmatprep.subr.bf16.mxu1 %v809_v1 }
 0x128   :  { %712 = vmatpush3.bf16.msra.mxu1 %v746_v28 }
 0x1ee   :  { %v194_v52 = vpop.f32.mrb[0].mxu1 }
 0x1ef   :  { %v202_v53 = vsel %vm86_vm2, %v194_v52, 0.0  ;;  %v691_v54 = vpop.f32.mrb[1].mxu1 }
 0x1f0   :  { %v203_v55 = vrot.slane %v202_v53, 4  ;;  %v197_v56 = vpop.f32.mrb[2].mxu1 }
 0x1f1   :  { %v692_v57 = vpop.f32.mrb[3].mxu1  ;;  %v315_v56 = vld [vmem:[%s1019_s3 + $0x7] sm:$0x1] }
 0x1f2   :  { %v204_v58 = vadd.f32 %v203_v55, %v202_v53  ;;  %v314_v53 = vld [vmem:[%s1019_s3 + $0x2] sm:$0x1] }
 0x1f4   :  { %v205_v59 = vrot.slane %v204_v58, 2 }
 0x1f6   :  { %v206_v60 = vadd.f32 %v205_v59, %v204_v58 }
 0x1f8   :  { %v207_v61 = vrot.slane %v206_v60, 1 }
 0x1fa   :  { %v208_v62 = vadd.f32 %v207_v61, %v206_v60 }
 0x1fc   :  { %v209_v63 = vmul.f32 0.125, %v208_v62 }
 0x1fe   :  { %v210_v0 = vsub.f32 %v194_v52, %v209_v63 }
 0x200   :  { %v211_v2 = vmul.f32 %v210_v0, %v210_v0 }
 0x202   :  { %v212_v3 = vsel %vm86_vm2, %v211_v2, 0.0 }
 0x203   :  { %v213_v4 = vrot.slane %v212_v3, 4 }
 0x205   :  { %v214_v5 = vadd.f32 %v213_v4, %v212_v3  ;;  %v747_v3 = vld [vmem:[%s1018_s2 + $0x60] sm:$0xff]   ;;  %v748_v4 = vld [vmem:[%s1018_s2 + $0x68] sm:$0xff]  }
 0x207   :  { %v215_v6 = vrot.slane %v214_v5, 2 }
 0x209   :  { %v216_v7 = vadd.f32 %v215_v6, %v214_v5  ;;  %v749_v5 = vld [vmem:[%s1018_s2 + $0x70] sm:$0xff]   ;;  %v750_v6 = vld [vmem:[%s1018_s2 + $0x78] sm:$0xff]  }
 0x20b   :  { %v217_v8 = vrot.slane %v216_v7, 1 }
 0x20d   :  { %v218_v9 = vadd.f32 %v217_v8, %v216_v7 }
 0x20f   :  { %v219_v10 = vmul.f32 0.125, %v218_v9 }
 0x211   :  { %v220_v11 = vadd.f32 1e-05, %v219_v10 }
 0x213   :  { %753 = vrsqrt.f32 %v220_v11 }
 0x21d   :  { %v754_v13 = vpop.eup %753 }
 0x21e   :  { %v222_v14 = vmul.f32 %v754_v13, %v200_v12 }
 0x220   :  { %v223_v16 = vmul.f32 %v222_v14, %v209_v63  ;;  %v228_v17 = vrot.slane %v222_v14, %v883_v35 }
 0x222   :  { %v224_v18 = vsub.f32 %v201_v15, %v223_v16  ;;  %v229_v19 = vmul.f32 %v228_v17, %v194_v52 }
 0x224   :  { %v233_v20 = vrot.slane %v224_v18, %v883_v35 }
 0x226   :  { %v234_v21 = vadd.f32 %v233_v20, %v229_v19 }
 0x228   :  { %vm235_vm4 = vcmp.gt.f32.partialorder %v234_v21, 0.0  ;;  %v236_v22 = vmul.f32 0.2, %v234_v21 }
 0x22a   :  { %v237_v23 = vsel %vm235_vm4, %v234_v21, %v236_v22 }
 0x22b   :  { %v246_v24 = vpack.c.bf16 %v237_v23, %v237_v23 }
 0x22d   :  { %702 = vmatmul.mubr.msk.bf16.vlgmr.msra.gmra.mrb[4].mxu0 %vm86_vm2, %v246_v24 }
 0x22e   :  { %725 = vmatprep.mubr.msk.bf16.mxu0 %vm810_vm0, %v809_v1  ;;  %718 = vmatpush3.bf16.msra.mxu0 %v747_v3  ;;  %v543_v3 = vld [vmem:[%s1019_s3 + $0x4] sm:$0x1] }
 0x22f   :  { %719 = vmatprep.subr.bf16.mxu0 %v809_v1 }
 0x232   :  { %720 = vmatpush3.bf16.msra.mxu0 %v748_v4 }
 0x233   :  { %721 = vmatprep.subr.bf16.mxu0 %v809_v1 }
 0x236   :  { %722 = vmatpush3.bf16.msra.mxu0 %v749_v5 }
 0x237   :  { %723 = vmatprep.subr.bf16.mxu0 %v809_v1 }
 0x23a   :  { %724 = vmatpush3.bf16.msra.mxu0 %v750_v6  ;;  %v544_v6 = vld [vmem:[%s1019_s3 + $0x9] sm:$0x1] }
 0x300   :  { %v308_v29 = vpop.f32.mrb[4].mxu0 }
 0x301   :  { %v316_v30 = vsel %vm86_vm2, %v308_v29, 0.0  ;;  %v703_v31 = vpop.f32.mrb[5].mxu0 }
 0x302   :  { %v317_v32 = vrot.slane %v316_v30, 4  ;;  %v311_v33 = vpop.f32.mrb[6].mxu0 }
 0x303   :  { %v704_v34 = vpop.f32.mrb[7].mxu0 }
 0x304   :  { %v318_v36 = vadd.f32 %v317_v32, %v316_v30  ;;  %v429_v32 = vld [vmem:[%s1019_s3 + $0x8] sm:$0x1] }
 0x306   :  { %v319_v37 = vrot.slane %v318_v36, 2 }
 0x308   :  { %v320_v38 = vadd.f32 %v319_v37, %v318_v36 }
 0x30a   :  { %v321_v39 = vrot.slane %v320_v38, 1 }
 0x30c   :  { %v322_v40 = vadd.f32 %v321_v39, %v320_v38 }
 0x30e   :  { %v323_v41 = vmul.f32 0.125, %v322_v40 }
 0x310   :  { %v324_v42 = vsub.f32 %v308_v29, %v323_v41 }
 0x312   :  { %v325_v43 = vmul.f32 %v324_v42, %v324_v42 }
 0x314   :  { %v326_v44 = vsel %vm86_vm2, %v325_v43, 0.0 }
 0x315   :  { %v327_v45 = vrot.slane %v326_v44, 4 }
 0x317   :  { %v328_v46 = vadd.f32 %v327_v45, %v326_v44 }
 0x319   :  { %v329_v47 = vrot.slane %v328_v46, 2 }
 0x31b   :  { %v330_v48 = vadd.f32 %v329_v47, %v328_v46 }
 0x31d   :  { %v331_v49 = vrot.slane %v330_v48, 1 }
 0x31f   :  { %v332_v50 = vadd.f32 %v331_v49, %v330_v48 }
 0x321   :  { %v333_v51 = vmul.f32 0.125, %v332_v50 }
 0x323   :  { %v334_v52 = vadd.f32 1e-05, %v333_v51 }
 0x325   :  { %755 = vrsqrt.f32 %v334_v52 }
 0x32f   :  { %v756_v54 = vpop.eup %755 }
 0x330   :  { %v336_v55 = vmul.f32 %v756_v54, %v314_v53 }
 0x332   :  { %v337_v57 = vmul.f32 %v336_v55, %v323_v41  ;;  %v342_v58 = vrot.slane %v336_v55, %v883_v35 }
 0x334   :  { %v338_v59 = vsub.f32 %v315_v56, %v337_v57  ;;  %v343_v60 = vmul.f32 %v342_v58, %v308_v29  ;;  %v428_v29 = vld [vmem:[%s1019_s3 + $0x3] sm:$0x1] }
 0x336   :  { %v347_v61 = vrot.slane %v338_v59, %v883_v35 }
 0x338   :  { %v348_v62 = vadd.f32 %v347_v61, %v343_v60 }
 0x33a   :  { %vm349_vm5 = vcmp.gt.f32.partialorder %v348_v62, 0.0  ;;  %v350_v63 = vmul.f32 0.2, %v348_v62 }
 0x33c   :  { %v351_v0 = vsel %vm349_vm5, %v348_v62, %v350_v63 }
 0x33d   :  { %v360_v2 = vpack.c.bf16 %v351_v0, %v351_v0 }
 0x33f   :  { %714 = vmatmul.mubr.msk.bf16.vlgmr.msra.gmra.mrb[4].mxu1 %vm86_vm2, %v360_v2 }
 0x412   :  { %v422_v7 = vpop.f32.mrb[4].mxu1 }
 0x413   :  { %v430_v8 = vsel %vm86_vm2, %v422_v7, 0.0  ;;  %v715_v9 = vpop.f32.mrb[5].mxu1 }
 0x414   :  { %v431_v10 = vrot.slane %v430_v8, 4  ;;  %v425_v11 = vpop.f32.mrb[6].mxu1 }
 0x415   :  { %v716_v12 = vpop.f32.mrb[7].mxu1 }
 0x416   :  { %v432_v13 = vadd.f32 %v431_v10, %v430_v8 }
 0x418   :  { %v433_v14 = vrot.slane %v432_v13, 2 }
 0x41a   :  { %v434_v15 = vadd.f32 %v433_v14, %v432_v13  ;;  %v648_v14 = vld [vmem:[%s1019_s3 + $0xa] ss:$0 sm:$0xff] }
 0x41c   :  { %v435_v16 = vrot.slane %v434_v15, 1 }
 0x41e   :  { %v436_v17 = vadd.f32 %v435_v16, %v434_v15 }
 0x420   :  { %v437_v18 = vmul.f32 0.125, %v436_v17 }
 0x422   :  { %v438_v19 = vsub.f32 %v422_v7, %v437_v18 }
 0x424   :  { %v439_v1 = vmul.f32 %v438_v19, %v438_v19 }
 0x426   :  { %v440_v20 = vsel %vm86_vm2, %v439_v1, 0.0 }
 0x427   :  { %v441_v21 = vrot.slane %v440_v20, 4 }
 0x429   :  { %v442_v22 = vadd.f32 %v441_v21, %v440_v20 }
 0x42b   :  { %v443_v23 = vrot.slane %v442_v22, 2 }
 0x42d   :  { %v444_v24 = vadd.f32 %v443_v23, %v442_v22 }
 0x42f   :  { %v445_v25 = vrot.slane %v444_v24, 1 }
 0x431   :  { %v446_v26 = vadd.f32 %v445_v25, %v444_v24 }
 0x433   :  { %v447_v27 = vmul.f32 0.125, %v446_v26 }
 0x435   :  { %v448_v28 = vadd.f32 1e-05, %v447_v27 }
 0x437   :  { %757 = vrsqrt.f32 %v448_v28 }
 0x441   :  { %v758_v30 = vpop.eup %757 }
 0x442   :  { %v450_v31 = vmul.f32 %v758_v30, %v428_v29 }
 0x444   :  { %v451_v33 = vmul.f32 %v450_v31, %v437_v18  ;;  %v456_v34 = vrot.slane %v450_v31, %v883_v35 }
 0x446   :  { %v452_v36 = vsub.f32 %v429_v32, %v451_v33  ;;  %v457_v37 = vmul.f32 %v456_v34, %v422_v7 }
 0x448   :  { %v461_v38 = vrot.slane %v452_v36, %v883_v35 }
 0x44a   :  { %v462_v39 = vadd.f32 %v461_v38, %v457_v37 }
 0x44c   :  { %vm463_vm6 = vcmp.gt.f32.partialorder %v462_v39, 0.0  ;;  %v464_v40 = vmul.f32 0.2, %v462_v39 }
 0x44e   :  { %v465_v41 = vsel %vm463_vm6, %v462_v39, %v464_v40 }
 0x44f   :  { %v475_v42 = vpack.c.bf16 %v465_v41, %v465_v41  ;;  %466 = vst.msk [vmem:[#allocation4] sm:$0xff] %vm86_vm2, %v465_v41 }
 0x451   :  { %726 = vmatmul.mubr.msk.bf16.vlgmr.msra.gmra.mrb[8].mxu0 %vm86_vm2, %v475_v42 }
 0x524   :  { %v537_v43 = vpop.f32.mrb[8].mxu0 }
 0x525   :  { %v545_v44 = vsel %vm86_vm2, %v537_v43, 0.0  ;;  %v727_v45 = vpop.f32.mrb[9].mxu0 }
 0x526   :  { %v546_v46 = vrot.slane %v545_v44, 4  ;;  %v540_v47 = vpop.f32.mrb[10].mxu0 }
 0x527   :  { %v728_v48 = vpop.f32.mrb[11].mxu0 }
 0x528   :  { %v547_v49 = vadd.f32 %v546_v46, %v545_v44 }
 0x52a   :  { %v548_v50 = vrot.slane %v547_v49, 2 }
 0x52c   :  { %v549_v51 = vadd.f32 %v548_v50, %v547_v49 }
 0x52e   :  { %v550_v52 = vrot.slane %v549_v51, 1 }
 0x530   :  { %v551_v53 = vadd.f32 %v550_v52, %v549_v51 }
 0x532   :  { %v552_v54 = vmul.f32 0.125, %v551_v53 }
 0x534   :  { %v553_v55 = vsub.f32 %v537_v43, %v552_v54 }
 0x536   :  { %v554_v56 = vmul.f32 %v553_v55, %v553_v55 }
 0x538   :  { %v555_v57 = vsel %vm86_vm2, %v554_v56, 0.0 }
 0x539   :  { %v556_v58 = vrot.slane %v555_v57, 4 }
 0x53b   :  { %v557_v59 = vadd.f32 %v556_v58, %v555_v57 }
 0x53d   :  { %v558_v60 = vrot.slane %v557_v59, 2 }
 0x53f   :  { %v559_v61 = vadd.f32 %v558_v60, %v557_v59 }
 0x541   :  { %v560_v62 = vrot.slane %v559_v61, 1 }
 0x543   :  { %v561_v63 = vadd.f32 %v560_v62, %v559_v61 }
 0x545   :  { %v562_v0 = vmul.f32 0.125, %v561_v63 }
 0x547   :  { %v563_v2 = vadd.f32 1e-05, %v562_v0 }
 0x549   :  { %759 = vrsqrt.f32 %v563_v2 }
 0x553   :  { %v760_v4 = vpop.eup %759 }
 0x554   :  { %v565_v5 = vmul.f32 %v760_v4, %v543_v3 }
 0x556   :  { %v566_v7 = vmul.f32 %v565_v5, %v552_v54  ;;  %v571_v8 = vrot.slane %v565_v5, %v883_v35 }
 0x558   :  { %v567_v9 = vsub.f32 %v544_v6, %v566_v7  ;;  %v572_v10 = vmul.f32 %v571_v8, %v537_v43 }
 0x55a   :  { %v576_v11 = vrot.slane %v567_v9, %v883_v35 }
 0x55c   :  { %v577_v12 = vadd.f32 %v576_v11, %v572_v10 }
 0x55e   :  { %vm578_vm7 = vcmp.gt.f32.partialorder %v577_v12, 0.0  ;;  %v579_v13 = vmul.f32 0.2, %v577_v12 }
 0x560   :  { %v580_v15 = vsel %vm578_vm7, %v577_v12, %v579_v13 }
 0x561   :  { %v587_v16 = vmul.f32 %v648_v14, %v580_v15 }
 0x563   :  { %v588_v17 = vsel %vm86_vm2, %v587_v16, 0.0 }
 0x564   :  { %589 = vadd.xlane.f32.xlu0 %v588_v17 }
 0x565   :  { %772 = shalt.err (!%p769_p4)
}
 0x566   :  { %s773_s26 = scalar_lea.hbm %s1021_s5, 128 }
 0x567   :  { %p774_p5 = scmp.ne.s32.totalorder %s1021_s5, %s773_s26  ;;  %p777_p6 = scmp.lt.u32.totalorder %s773_s26, %s1021_s5 }
 0x569   :  { %p779_p7 = pnand %p777_p6, %p774_p5 }
 0x56b   :  { %782 = shalt.err (!%p779_p7)
}
 0x56c   :  { %616 = dma.vmem_to_hbm [thread:$0]  %s614_s1, 128, %s1021_s5, [#allocation5]   ;;  %v649_v35 = vld [vmem:[%s1019_s3 + $0xb] ss:$0 sm:$0xff] }
 0x56d   :  { %s812_s10 = smov [#allocation2]  }
 0x56e   :  { %s603_s11 = sshll.u32 %s812_s10, 4  ;;  %s604_s11 = int_to_ptr.vmem [resolvable:$true] %s603_s11 }
 0x56f   :  { %s783_s12 = scalar_lea.vmem %s604_s11, 128  ;;  %p788_p9 = scmp.lt.s32.totalorder %s604_s11, %s604_s11 }
 0x570   :  { %p784_p8 = scmp.ne.s32.totalorder %s604_s11, %s783_s12  ;;  %p789_p10 = scmp.lt.s32.totalorder %s783_s12, %s783_s12 }
 0x572   :  { %p790_p11 = por %p789_p10, %p788_p9 }
 0x574   :  { %p791_p12 = pnand %p790_p11, %p784_p8 }
 0x5f1   :  { %v590_v18 = vpop.xlane.xlu0 %589 }
 0x5f2   :  { %v595_v19 = vadd.f32 %v649_v35, %v590_v18 }
 0x5f4   :  { %596 = vst [vmem:[#allocation2] sm:$0xff] %v595_v19 }
 0x5f5   :  { %794 = shalt.err (!%p791_p12)
}
 0x5f6   :  { %s795_s5 = scalar_lea.hbm %s1020_s4, 128 }
 0x5f7   :  { %p796_p13 = scmp.ne.s32.totalorder %s1020_s4, %s795_s5  ;;  %p799_p0 = scmp.lt.u32.totalorder %s795_s5, %s1020_s4 }
 0x5f9   :  { %p801_p1 = pnand %p799_p0, %p796_p13 }
 0x5fb   :  { %804 = shalt.err (!%p801_p1)
}
 0x5fc   :  { %606 = dma.vmem_to_hbm [thread:$0]  %s604_s11, 128, %s1020_s4, [#allocation3]  }
 0x5fd   :  { %805 = dma.done.wait [#allocation3], 128  }
 0x5fe   :  { %806 = vsyncadd [#allocation3], 4294967168 }
 0x5ff   :  { %807 = dma.done.wait [#allocation5], 128  }
 0x600   :  { %808 = vsyncadd [#allocation5], 4294967168 }
 0x601   :  { %623 = vsyncpa [#allocation3], 1 }
 0x602   :  { %624 = vsyncpa [#allocation5], 1 }

</bundles_post_ra>
